<compile_context>
chip_gen: v7x
topology: tpu7x:2x2x1
jax: 0.10.0
libtpu: 0.0.40
codegen_flags: <defaults>
</compile_context>

<pallas_src>
import functools

import jax
import jax.numpy as jnp
from jax.experimental import pallas as pl
from jax.experimental.pallas import tpu as pltpu


# ---------------------------------------------------------------------------
# Kernels -- all operate in the transposed (TB, C, T) layout, reduce over
# axis=-1 (time on lanes).  Stats are fused: stat[..., 0] = shift, [..., 1]=std.
# ---------------------------------------------------------------------------
def _norm_kernel(x_ref, y_ref, stat_ref, *, eps, subtract_last):
    x = x_ref[...].astype(jnp.float32)                          # (TB, C, T)
    mean = jnp.mean(x, axis=-1, keepdims=True)                  # (TB, C, 1)
    var = jnp.mean((x - mean) ** 2, axis=-1, keepdims=True)     # unbiased=False
    std = jnp.sqrt(var + eps)
    shift = x[:, :, -1:] if subtract_last else mean
    inv_std = 1.0 / std                                         # tiny: per (b,c)
    y = (x - shift) * inv_std
    y_ref[...] = y.astype(y_ref.dtype)
    stat_ref[...] = jnp.concatenate([shift, std], axis=-1).astype(stat_ref.dtype)


def _norm_affine_kernel(x_ref, w_ref, b_ref, y_ref, stat_ref, *,
                        eps, subtract_last):
    x = x_ref[...].astype(jnp.float32)
    mean = jnp.mean(x, axis=-1, keepdims=True)
    var = jnp.mean((x - mean) ** 2, axis=-1, keepdims=True)
    std = jnp.sqrt(var + eps)
    shift = x[:, :, -1:] if subtract_last else mean
    inv_std = 1.0 / std
    y = (x - shift) * inv_std
    # w_ref/b_ref: (C, 1) resident tiles, broadcast along lanes (time)
    y = y * w_ref[...][None] + b_ref[...][None]
    y_ref[...] = y.astype(y_ref.dtype)
    stat_ref[...] = jnp.concatenate([shift, std], axis=-1).astype(stat_ref.dtype)


def _stats_kernel(x_ref, stat_ref, *, eps, subtract_last):
    # non_norm=True: statistics are still computed, but no y is produced.
    x = x_ref[...].astype(jnp.float32)
    mean = jnp.mean(x, axis=-1, keepdims=True)
    var = jnp.mean((x - mean) ** 2, axis=-1, keepdims=True)
    std = jnp.sqrt(var + eps)
    shift = x[:, :, -1:] if subtract_last else mean
    stat_ref[...] = jnp.concatenate([shift, std], axis=-1).astype(stat_ref.dtype)


def _denorm_kernel(x_ref, stat_ref, y_ref):
    x = x_ref[...].astype(jnp.float32)
    stat = stat_ref[...]
    shift = stat[:, :, 0:1]
    std = stat[:, :, 1:2]
    y_ref[...] = (x * std + shift).astype(y_ref.dtype)


def _denorm_affine_kernel(x_ref, w_ref, b_ref, stat_ref, y_ref, *, eps):
    x = x_ref[...].astype(jnp.float32)
    inv_w = 1.0 / (w_ref[...] + eps * eps)                      # (C, 1) tiny
    x = (x - b_ref[...][None]) * inv_w[None]
    stat = stat_ref[...]
    shift = stat[:, :, 0:1]
    std = stat[:, :, 1:2]
    y_ref[...] = (x * std + shift).astype(y_ref.dtype)


# ---------------------------------------------------------------------------
# Block-size selection: biggest batch-block that fits ~2 MiB of padded VMEM,
# while keeping the grid >= 2 (v7x dual TensorCore) and dividing B evenly.
# ---------------------------------------------------------------------------
_VMEM_LIMIT_BYTES = 32 * 1024 * 1024   # safe on v5e / v6e / v7x
_TARGET_BLOCK_BYTES = 2 << 20          # ~2 MiB per buffer -> >85% HBM roofline


def _pick_batch_block(B, C, T):
    c_pad = -(-C // 8) * 8
    t_pad = -(-T // 128) * 128
    per_batch = c_pad * t_pad * 4                 # fp32 working precision
    tb = max(1, _TARGET_BLOCK_BYTES // per_batch)
    tb = min(tb, B)
    if B >= 2:
        tb = min(tb, max(1, B // 2))              # grid >= 2 for dual-TC chips
    while B % tb != 0:                            # avoid partial blocks
        tb -= 1
    return int(tb)


def _compiler_params():
    return pltpu.CompilerParams(
        dimension_semantics=("parallel",),
        vmem_limit_bytes=_VMEM_LIMIT_BYTES,
    )


# ---------------------------------------------------------------------------
# Module wrapper
# ---------------------------------------------------------------------------
class Normalize:
    def __init__(self, num_features, eps=1e-5, affine=False,
                 subtract_last=False, non_norm=False):
        self.num_features = num_features
        self.eps = float(eps)
        self.affine = affine
        self.subtract_last = subtract_last
        self.non_norm = non_norm
        if affine:
            # matches nn.Parameter(torch.ones/zeros(num_features))
            self.affine_weight = jnp.ones((num_features,), jnp.float32)
            self.affine_bias = jnp.zeros((num_features,), jnp.float32)
        # fused stats: (B, C, 2) with [..., 0] = shift (mean or last),
        #              [..., 1] = stdev.  Channel-major to match kernel layout.
        self.stats = None
        # TODO(synk): stats are Python-side state (as in the PyTorch module);
        # norm and denorm must run in the same trace for jit/grad composition.

    # -------------------------------------------------------------------
    def __call__(self, x, mode):
        if mode == "norm":
            return self._norm(x)
        elif mode == "denorm":
            return self._denorm(x)
        raise NotImplementedError(mode)

    # -------------------------------------------------------------------
    def _norm(self, x):
        B, T, C = x.shape
        assert C == self.num_features
        xt = jnp.transpose(x, (0, 2, 1))          # (B, C, T): time on lanes
        tb = _pick_batch_block(B, C, T)
        grid = (B // tb,)
        x_spec = pl.BlockSpec((tb, C, T), lambda i: (i, 0, 0))
        stat_spec = pl.BlockSpec((tb, C, 2), lambda i: (i, 0, 0))

        if self.non_norm:
            # stats-only path: skip producing/writing y entirely.
            stats = pl.pallas_call(
                functools.partial(_stats_kernel, eps=self.eps,
                                  subtract_last=self.subtract_last),
                out_shape=jax.ShapeDtypeStruct((B, C, 2), jnp.float32),
                grid_spec=pl.GridSpec(grid=grid, in_specs=[x_spec],
                                      out_specs=stat_spec),
                compiler_params=_compiler_params(),
            )(xt)
            self.stats = stats
            return x

        if self.affine:
            kern = functools.partial(_norm_affine_kernel, eps=self.eps,
                                     subtract_last=self.subtract_last)
            p_spec = pl.BlockSpec((C, 1), lambda i: (0, 0))   # resident tiles
            in_specs = [x_spec, p_spec, p_spec]
            args = (xt, jnp.reshape(self.affine_weight, (C, 1)),
                    jnp.reshape(self.affine_bias, (C, 1)))
        else:
            kern = functools.partial(_norm_kernel, eps=self.eps,
                                     subtract_last=self.subtract_last)
            in_specs = [x_spec]
            args = (xt,)

        yt, stats = pl.pallas_call(
            kern,
            out_shape=(
                jax.ShapeDtypeStruct((B, C, T), x.dtype),
                jax.ShapeDtypeStruct((B, C, 2), jnp.float32),
            ),
            grid_spec=pl.GridSpec(grid=grid, in_specs=in_specs,
                                  out_specs=(x_spec, stat_spec)),
            compiler_params=_compiler_params(),
        )(*args)

        self.stats = stats
        return jnp.transpose(yt, (0, 2, 1))

    # -------------------------------------------------------------------
    def _denorm(self, x):
        if self.non_norm:
            return x
        assert self.stats is not None, "denorm called before norm"
        B, T, C = x.shape
        xt = jnp.transpose(x, (0, 2, 1))
        tb = _pick_batch_block(B, C, T)
        grid = (B // tb,)
        x_spec = pl.BlockSpec((tb, C, T), lambda i: (i, 0, 0))
        stat_spec = pl.BlockSpec((tb, C, 2), lambda i: (i, 0, 0))

        if self.affine:
            kern = functools.partial(_denorm_affine_kernel, eps=self.eps)
            p_spec = pl.BlockSpec((C, 1), lambda i: (0, 0))
            in_specs = [x_spec, p_spec, p_spec, stat_spec]
            args = (xt, jnp.reshape(self.affine_weight, (C, 1)),
                    jnp.reshape(self.affine_bias, (C, 1)), self.stats)
        else:
            kern = _denorm_kernel
            in_specs = [x_spec, stat_spec]
            args = (xt, self.stats)

        yt = pl.pallas_call(
            kern,
            out_shape=jax.ShapeDtypeStruct((B, C, T), x.dtype),
            grid_spec=pl.GridSpec(grid=grid, in_specs=in_specs,
                                  out_specs=x_spec),
            compiler_params=_compiler_params(),
        )(*args)
        return jnp.transpose(yt, (0, 2, 1))


# ---------------------------------------------------------------------------
if __name__ == "__main__":
    key = jax.random.PRNGKey(0)
    k1, k2, k3 = jax.random.split(key, 3)
    B, T, C = 4, 128, 8                     # batch, seq_len (lanes), features
    eps = 1e-5
    x = jax.random.normal(k1, (B, T, C), jnp.float32) * 3.0 + 1.5

    # pure-JAX references
    mean_ref = jnp.mean(x, axis=1, keepdims=True)
    var_ref = jnp.mean((x - mean_ref) ** 2, axis=1, keepdims=True)
    std_ref = jnp.sqrt(var_ref + eps)

    # ---- base path (no affine, mean-shift) --------------------------------
    norm = Normalize(C, eps=eps)
    y = jax.block_until_ready(norm(x, "norm"))
    y_ref = (x - mean_ref) / std_ref
    assert jnp.allclose(y, y_ref, atol=1e-5, rtol=1e-5), "norm mismatch"
    x_rec = jax.block_until_ready(norm(y, "denorm"))
    assert jnp.allclose(x_rec, x, atol=1e-4, rtol=1e-4), "denorm mismatch"

    # ---- affine path -------------------------------------------------------
    aff = Normalize(C, eps=eps, affine=True)
    aff.affine_weight = jax.random.uniform(k2, (C,), jnp.float32, 0.5, 1.5)
    aff.affine_bias = jax.random.uniform(k3, (C,), jnp.float32, -0.5, 0.5)
    ya = jax.block_until_ready(aff(x, "norm"))
    ya_ref = (x - mean_ref) / std_ref * aff.affine_weight + aff.affine_bias
    assert jnp.allclose(ya, ya_ref, atol=1e-5, rtol=1e-5), "affine norm mismatch"
    xa_rec = jax.block_until_ready(aff(ya, "denorm"))
    assert jnp.allclose(xa_rec, x, atol=1e-4, rtol=1e-4), "affine denorm mismatch"

    # ---- subtract_last path ------------------------------------------------
    sl = Normalize(C, eps=eps, subtract_last=True)
    ys = jax.block_until_ready(sl(x, "norm"))
    ys_ref = (x - x[:, -1:, :]) / std_ref
    assert jnp.allclose(ys, ys_ref, atol=1e-5, rtol=1e-5), "subtract_last mismatch"
    xs_rec = jax.block_until_ready(sl(ys, "denorm"))
    assert jnp.allclose(xs_rec, x, atol=1e-4, rtol=1e-4), "subtract_last denorm mismatch"

    # ---- non_norm path (stats-only kernel, passthrough) --------------------
    nn_ = Normalize(C, eps=eps, non_norm=True)
    yn = jax.block_until_ready(nn_(x, "norm"))
    assert jnp.allclose(yn, x), "non_norm should pass x through"
    stats = nn_.stats                                          # (B, C, 2)
    assert jnp.allclose(stats[:, :, 0], jnp.squeeze(mean_ref, 1),
                        atol=1e-5, rtol=1e-5), "non_norm mean mismatch"
    assert jnp.allclose(stats[:, :, 1], jnp.squeeze(std_ref, 1),
                        atol=1e-5, rtol=1e-5), "non_norm std mismatch"
    assert jnp.allclose(nn_(x, "denorm"), x), "non_norm denorm passthrough"

    print("KERNEL_OK")
</pallas_src>

<mosaic_0001>
module attributes {stable_mosaic.version = 11 : i64} {
  func.func @_norm_kernel(%arg0: i32, %arg1: memref<2x8x128xf32, #tpu.memory_space<vmem>>, %arg2: memref<2x8x128xf32, #tpu.memory_space<vmem>>, %arg3: memref<2x8x2xf32, #tpu.memory_space<vmem>>) attributes {dimension_semantics = [#tpu.dimension_semantics<parallel>], iteration_bounds = array<i64: 2>, scalar_prefetch = 0 : i64, scratch_operands = 0 : i64, tpu.core_type = #tpu.core_type<tc>, window_params = [{transform_indices = @transform_0, window_bounds = array<i64: 2, 8, 128>}, {transform_indices = @transform_1, window_bounds = array<i64: 2, 8, 128>}, {transform_indices = @transform_2, window_bounds = array<i64: 2, 8, 2>}]} {
    %c0 = arith.constant 0 : index
    %c0_0 = arith.constant 0 : index
    %c0_1 = arith.constant 0 : index
    %0 = vector.load %arg1[%c0, %c0_0, %c0_1] : memref<2x8x128xf32, #tpu.memory_space<vmem>>, vector<2x8x128xf32>
    %cst = arith.constant dense<0.000000e+00> : vector<2x8xf32>
    %1 = vector.multi_reduction <add>, %0, %cst [2] : vector<2x8x128xf32> to vector<2x8xf32>
    %2 = vector.shape_cast %1 : vector<2x8xf32> to vector<2x8x1xf32>
    %cst_2 = arith.constant 1.280000e+02 : f32
    %3 = vector.broadcast %cst_2 : f32 to vector<2x8x1xf32>
    %4 = arith.divf %2, %3 : vector<2x8x1xf32>
    %5 = vector.broadcast %4 : vector<2x8x1xf32> to vector<2x8x128xf32>
    %6 = arith.subf %0, %5 : vector<2x8x128xf32>
    %7 = arith.mulf %6, %6 : vector<2x8x128xf32>
    %cst_3 = arith.constant dense<0.000000e+00> : vector<2x8xf32>
    %8 = vector.multi_reduction <add>, %7, %cst_3 [2] : vector<2x8x128xf32> to vector<2x8xf32>
    %9 = vector.shape_cast %8 : vector<2x8xf32> to vector<2x8x1xf32>
    %cst_4 = arith.constant 1.280000e+02 : f32
    %10 = vector.broadcast %cst_4 : f32 to vector<2x8x1xf32>
    %11 = arith.divf %9, %10 : vector<2x8x1xf32>
    %cst_5 = arith.constant 9.99999974E-6 : f32
    %12 = vector.broadcast %cst_5 : f32 to vector<2x8x1xf32>
    %13 = arith.addf %11, %12 : vector<2x8x1xf32>
    %14 = math.sqrt %13 : vector<2x8x1xf32>
    %cst_6 = arith.constant 1.000000e+00 : f32
    %15 = vector.broadcast %cst_6 : f32 to vector<2x8x1xf32>
    %16 = arith.divf %15, %14 : vector<2x8x1xf32>
    %17 = vector.broadcast %4 : vector<2x8x1xf32> to vector<2x8x128xf32>
    %18 = arith.subf %0, %17 : vector<2x8x128xf32>
    %19 = vector.broadcast %16 : vector<2x8x1xf32> to vector<2x8x128xf32>
    %20 = arith.mulf %18, %19 : vector<2x8x128xf32>
    %c0_7 = arith.constant 0 : index
    %c0_8 = arith.constant 0 : index
    %c0_9 = arith.constant 0 : index
    %21 = vector.load %arg2[%c0_7, %c0_8, %c0_9] : memref<2x8x128xf32, #tpu.memory_space<vmem>>, vector<2x8x128xf32>
    tpu.vector_store %arg2[%c0_7, %c0_8, %c0_9], %20 {strides = array<i32>} : memref<2x8x128xf32, #tpu.memory_space<vmem>>, vector<2x8x128xf32>,
    %22 = tpu.concatenate %4, %14 in 2 : vector<2x8x1xf32>, vector<2x8x1xf32> -> vector<2x8x2xf32>
    %c0_10 = arith.constant 0 : index
    %c0_11 = arith.constant 0 : index
    %c0_12 = arith.constant 0 : index
    %23 = vector.load %arg3[%c0_10, %c0_11, %c0_12] : memref<2x8x2xf32, #tpu.memory_space<vmem>>, vector<2x8x2xf32>
    tpu.vector_store %arg3[%c0_10, %c0_11, %c0_12], %22 {strides = array<i32>} : memref<2x8x2xf32, #tpu.memory_space<vmem>>, vector<2x8x2xf32>,
    return
  }
  func.func @transform_0(%arg0: i32) -> (i32, i32, i32) {
    %c0_i32 = arith.constant 0 : i32
    %c0_i32_0 = arith.constant 0 : i32
    %c0_i32_1 = arith.constant 0 : i32
    return %arg0, %c0_i32, %c0_i32_0 : i32, i32, i32
  }
  func.func @transform_1(%arg0: i32) -> (i32, i32, i32) {
    %c0_i32 = arith.constant 0 : i32
    %c0_i32_0 = arith.constant 0 : i32
    %c0_i32_1 = arith.constant 0 : i32
    return %arg0, %c0_i32, %c0_i32_0 : i32, i32, i32
  }
  func.func @transform_2(%arg0: i32) -> (i32, i32, i32) {
    %c0_i32 = arith.constant 0 : i32
    %c0_i32_0 = arith.constant 0 : i32
    %c0_i32_1 = arith.constant 0 : i32
    return %arg0, %c0_i32, %c0_i32_0 : i32, i32, i32
  }
}

</mosaic_0001>

<bundles_post_ra>
// kernel: tpu_custom_call.1
= control target key start
LH: loop header
LB: loop body
LE: loop exit
PB: predicated region body
PF: predicated region fallthrough
CT: control target
= control target key end

     0   :  { %8 = vsyncpa [#allocation3], 0  ;;  %s717_s0 = inlined_call_operand.hbm [shape: f32[4,8,128], index: 0, kind: input, shape index: {}]   ;;  %s718_s1 = inlined_call_operand.hbm [shape: f32[4,8,128], index: 1, kind: output, shape index: {0}]   ;;  %s719_s2 = inlined_call_operand.vmem [shape: f32[4,8,2], index: 2, kind: output, shape index: {1}]  }
   0x1   :  { %10 = vsyncpa [#allocation3 + $0x1], 0 }
   0x2   :  { %11 = vsyncpa [#allocation4], 0 }
   0x3   :  { %13 = vsyncpa [#allocation4 + $0x1], 0  ;;  %s543_s9 = smov 0   ;;  %s545_s10 = smov 0  }
   0x4   :  { %s547_s11 = smov 0   ;;  %s549_s12 = smov 0  }
   0x5 LB: > { %s564_s13 = sadd.s32 4294967295, %s520_s12   ;;  %s348_s14 = sadd.s32 4294967294, %s520_s12   ;;  %s520_s12 = sphi %s549_s12, %s732_s12   ;;  %s516_s11 = sphi %s547_s11, %s731_s11   ;;  %s512_s10 = sphi %s545_s10, %s730_s10   ;;  %s508_s9 = sphi %s543_s9, %s729_s9  }
   0x6   : > { %s568_s15 = sadd.s32 1, %s520_s12   ;;  %s26_s16 = sadd.s32 1, %s516_s11 }
   0x7   : > { %s23_s17 = ssub.s32 %s520_s12, %s568_s15  ;;  %p33_p0 = scmp.ne.s32.totalorder %s516_s11, %s512_s10 }
   0x8   : > { %p24_p1 = scmp.eq.s32.totalorder %s23_s17, 0  ;;  %p34_p2 = scmp.eq.s32.totalorder %s520_s12, 0 }
   0x9   : > { %p39_p3 = scmp.ne.s32.totalorder %s512_s10, %s508_s9  ;;  %p40_p4 = scmp.eq.s32.totalorder %s564_s13, 0 }
   0xa   : > { %s580_s18 = scalar_select %p24_p1, %s516_s11, %s26_s16  }
   0xb   : > { %p582_p5 = por %p34_p2, %p33_p0  ;;  %p586_p6 = por %p40_p4, %p39_p3 }
   0xc   : > { %p63_p7 = scmp.eq.s32.totalorder %s564_s13, 1  ;;  %p69_p8 = scmp.eq.s32.totalorder %s348_s14, 1 }
   0xd   : > { %p378_p10 = scmp.lt.s32.totalorder %s520_s12, 2  ;;  %s115_s23 = sand.u32 1, %s516_s11  }
   0xe   : > { %p593_p11 = por %p63_p7, %p33_p0  ;;  %p597_p12 = por %p69_p8, %p39_p3 }
   0xf   : > { %s364_s24 = sshll.u32 %s520_s12, 8  ;;  %s351_s25 = sshll.u32 %s115_s23, 4 }
  0x10   : > { %s723_s21 = scalar_select %p593_p11, 1, 0 }
  0x11   : > { %s724_s22 = scalar_select %p597_p12, 1, 0 }
  0x12   : > { %s606_s28 = scalar_lea.hbm %s717_s0, %s364_s24  ;;  %s119_s29 = scalar_lea.vmem [#allocation2], %s351_s25 }
  0x13   : > { %s126_s30 = sshll.u32 %s119_s29, 4  ;;  %p610_p13 = pnand %p378_p10, %p582_p5  ;;  %s614_s30 = int_to_ptr.vmem [resolvable:$true] %s126_s30 }
  0x14   : > { %s616_s4 = scalar_lea.sflag [#allocation3], %s115_s23  ;;  %s424_s5 = scalar_lea.hbm %s606_s28, 256 }
  0x15   : > { %p425_p0 = scmp.ne.s32.totalorder %s606_s28, %s424_s5  ;;  %p426_p1 = pneg %p610_p13 }
  0x16   : > { %s429_s8 = scalar_lea.hbm %s717_s0, 512  ;;  %p430_p4 = scmp.lt.u32.totalorder %s606_s28, %s717_s0 }
  0x17   : > { %p427_p2 = pnand %p426_p1, %p425_p0  ;;  %p431_p5 = scmp.lt.u32.totalorder %s429_s8, %s424_s5 }
  0x18   : > { %p433_p8 = scmp.lt.u32.totalorder %s424_s5, %s606_s28 }
  0x19   : > { %p428_p3 = pneg %p427_p2  ;;  %p432_p7 = por %p431_p5, %p430_p4 }
  0x1b   : > { %p434_p10 = por %p433_p8, %p432_p7 }
  0x1d   : > { %p435_p9 = pnand %p434_p10, %p428_p3 }
  0x1f   : > { %438 = shalt.err (!%p435_p9)
}
  0x20   : > { %s439_s17 = scalar_lea.vmem %s614_s30, 256  ;;  %s522_s19 = smov [#allocation2]  }
  0x21   : > { %p440_p0 = scmp.ne.s32.totalorder %s614_s30, %s439_s17  ;;  %s444_s23 = sshll.u32 %s522_s19, 4  ;;  %s445_s23 = int_to_ptr.vmem [resolvable:$false] %s444_s23 }
  0x22   : > { %s446_s24 = scalar_lea.vmem %s445_s23, 512  ;;  %p447_p11 = scmp.lt.s32.totalorder %s614_s30, %s445_s23 }
  0x23   : > { %p442_p2 = pnand %p440_p0, %p426_p1  ;;  %p448_p4 = scmp.lt.s32.totalorder %s446_s24, %s439_s17 }
  0x25   : > { %p443_p12 = pneg %p442_p2  ;;  %p449_p5 = por %p448_p4, %p447_p11 }
  0x27   : > { %p450_p7 = pnand %p449_p5, %p443_p12 }
  0x29   : > { %453 = shalt.err (!%p450_p7)
}
  0x2a   : > { %s523_s25 = smov 128   ;;  %s524_s26 = smov 8  }
  0x2b   : > { %373 = dma.hbm_to_vmem [thread:$0]  (!%p610_p13), %s606_s28, 256, %s614_s30, %s616_s4, %s523_s25, %s523_s25, %s524_s26  }
  0x2c   : > { %p354_p9 = scmp.ge.s32.totalorder %s520_s12, 1  ;;  %p134_p1 = scmp.lt.s32.totalorder %s520_s12, 3 }
  0x2e   : > { %p135_p3 = pnand %p354_p9, %p134_p1 }
  0x2f   : > { %s647_s27 = sand.u32 (!%p135_p3), 1, %s512_s10  }
  0x30   : > { %138 = sbr.rel (%p135_p3) target bundleno = 398 (0x18e), region = 24  ;;  %s355_s29 = sshll.u32 (!%p135_p3), %s647_s27, 4 }
  0x31   : > { %s141_s5 = scalar_lea.sflag (!%p135_p3), [#allocation3], %s647_s27  ;;  %s144_s6 = scalar_lea.vmem (!%p135_p3), [#allocation2], %s355_s29 }
  0x37   : > { %499 = dma.done.wait (%p586_p6), %s141_s5, 256  }
  0x38   : > { %501 = vsyncadd (%p586_p6), %s141_s5, 4294967040  ;;  %v178_v0 = vld [vmem:[%s144_s6] sm:$0xff]  ;;  %v179_v1 = vld [vmem:[%s144_s6 + $0x8] sm:$0xff]  ;;  %s357_s20 = sshll.u32 %s564_s13, 1  ;;  %vm221_vm0 = vcmask 7168   ;;  %vm224_vm2 = vcmask 15360  }
  0x39   : > { %180 = vadd.xlane.f32.xlu0 %v178_v0  ;;  %p173_p6 = scmp.lt.s32.totalorder %s357_s20, 3  ;;  %s365_s7 = sshll.u32 %s564_s13, 8 }
  0x3a   : > { %s162_s8 = scalar_lea.vmem [#allocation5], %s355_s29  ;;  %s671_s19 = scalar_lea.hbm %s718_s1, %s365_s7 }
  0x3b   : > { %s734_s20 = smov (!%p173_p6, %s357_s20), 3  ;;  %s246_s14 = sshll.u32 %s162_s8, 4  ;;  %s673_s14 = int_to_ptr.vmem [resolvable:$true] %s246_s14 }
  0x3c   : > { %s358_s28 = sshll.u32 %s734_s20, 3  ;;  %s228_s23 = scalar_lea.sflag [#allocation4], %s647_s27 }
  0x3d   : > { %182 = vadd.xlane.f32.xlu0 %v179_v1  ;;  %s176_s4 = scalar_lea.vmem %s719_s2, %s358_s28  ;;  %s454_s24 = scalar_lea.vmem %s673_s14, 256 }
  0x3e   : > { %p455_p11 = scmp.ne.s32.totalorder %s673_s14, %s454_s24  ;;  %p726_p12 = scmp.ne.s32.totalorder %s723_s21, 0 }
  0x3f   : > { %s525_s13 = smov [#allocation5]  }
  0x40   : > { %p456_p13 = pnand %p455_p11, %p726_p12  ;;  %s458_s25 = sshll.u32 %s525_s13, 4  ;;  %s459_s25 = int_to_ptr.vmem [resolvable:$false] %s458_s25 }
  0x41   : > { %s460_s26 = scalar_lea.vmem %s459_s25, 512  ;;  %p461_p10 = scmp.lt.s32.totalorder %s673_s14, %s459_s25 }
  0x42   : > { %p457_p8 = pneg %p456_p13  ;;  %p462_p0 = scmp.lt.s32.totalorder %s460_s26, %s454_s24 }
  0x44   : > { %p463_p2 = por %p462_p0, %p461_p10 }
  0x46   : > { %p464_p4 = pnand %p463_p2, %p457_p8 }
  0xc6   : > { %v181_v2 = vpop.xlane.xlu0 %180 }
  0xc7   : > { %v185_v3 = vmul.f32 0.0078125, %v181_v2 }
  0xc9   : > { %v187_v4 = vsub.f32 %v178_v0, %v185_v3 }
  0xca   : > { %v183_v5 = vpop.xlane.xlu0 %182 }
  0xcb   : > { %v186_v6 = vmul.f32 0.0078125, %v183_v5  ;;  %v189_v7 = vmul.f32 %v187_v4, %v187_v4 }
  0xcd   : > { %v188_v8 = vsub.f32 %v179_v1, %v186_v6  ;;  %191 = vadd.xlane.f32.xlu1 %v189_v7 }
  0xcf   : > { %v190_v9 = vmul.f32 %v188_v8, %v188_v8 }
  0xd1   : > { %193 = vadd.xlane.f32.xlu1 %v190_v9 }
 0x15a   : > { %v192_v10 = vpop.xlane.xlu1 %191 }
 0x15b   : > { %v195_v11 = vmul.f32 0.0078125, %v192_v10 }
 0x15d   : > { %v197_v12 = vadd.f32 1e-05, %v195_v11 }
 0x15e   : > { %v194_v13 = vpop.xlane.xlu1 %193 }
 0x15f   : > { %416 = vrsqrt.f32 %v197_v12  ;;  %v196_v14 = vmul.f32 0.0078125, %v194_v13  ;;  %vm201_vm1 = vcmp.eq.f32.partialorder %v197_v12, inf  ;;  %v204_v18 = vand.u32 2147483648, %v197_v12 }
 0x160   : > { %vm203_vm3 = vcmp.eq.f32.partialorder %v197_v12, 0.0 }
 0x161   : > { %v198_v15 = vadd.f32 1e-05, %v196_v14 }
 0x163   : > { %418 = vrsqrt.f32 %v198_v15  ;;  %vm208_vm4 = vcmp.eq.f32.partialorder %v198_v15, inf  ;;  %v211_v24 = vand.u32 2147483648, %v198_v15  ;;  %vm210_vm5 = vcmp.eq.f32.partialorder %v198_v15, 0.0 }
 0x169   : > { %v417_v16 = vpop.eup %416 }
 0x16a   : > { %v200_v17 = vmul.f32 %v417_v16, %v197_v12 }
 0x16c   : > { %v202_v19 = vsel %vm201_vm1, %v197_v12, %v200_v17 }
 0x16d   : > { %v205_v20 = vsel %vm203_vm3, %v204_v18, %v202_v19  ;;  %v419_v21 = vpop.eup %418 }
 0x16e   : > { %420 = vrcp.f32 %v205_v20  ;;  %v222_v22 = vsel %vm221_vm0, %v185_v3, %v205_v20  ;;  %v207_v23 = vmul.f32 %v419_v21, %v198_v15 }
 0x16f   : > { %225 = vst.msk [vmem:[%s176_s4] sm:$0xff] %vm224_vm2, %v222_v22 }
 0x170   : > { %v209_v25 = vsel %vm208_vm4, %v198_v15, %v207_v23 }
 0x171   : > { %v212_v26 = vsel %vm210_vm5, %v211_v24, %v209_v25 }
 0x172   : > { %422 = vrcp.f32 %v212_v26  ;;  %v223_v27 = vsel %vm221_vm0, %v186_v6, %v212_v26 }
 0x173   : > { %226 = vst.msk [vmem:[%s176_s4 + $0x8] sm:$0xff] %vm224_vm2, %v223_v27 }
 0x178   : > { %v421_v28 = vpop.eup %420 }
 0x179   : > { %v217_v29 = vmul.f32 %v421_v28, %v187_v4 }
 0x17b   : > { %219 = vst [vmem:[%s162_s8] sm:$0xff] %v217_v29 }
 0x17c   : > { %v423_v30 = vpop.eup %422 }
 0x17d   : > { %v218_v31 = vmul.f32 %v423_v30, %v188_v8 }
 0x17f   : > { %220 = vst [vmem:[%s162_s8 + $0x8] sm:$0xff] %v218_v31 }
 0x180   : > { %467 = shalt.err (!%p464_p4)
}
 0x181   : > { %s468_s29 = scalar_lea.hbm %s671_s19, 256  ;;  %s472_s20 = scalar_lea.hbm %s718_s1, 512 }
 0x182   : > { %p469_p5 = scmp.ne.s32.totalorder %s671_s19, %s468_s29  ;;  %p473_p1 = scmp.lt.u32.totalorder %s671_s19, %s718_s1 }
 0x183   : > { %p474_p3 = scmp.lt.u32.totalorder %s472_s20, %s468_s29  ;;  %p476_p11 = scmp.lt.u32.totalorder %s468_s29, %s671_s19 }
 0x184   : > { %p470_p7 = pnand %p469_p5, %p726_p12 }
 0x185   : > { %p475_p6 = por %p474_p3, %p473_p1 }
 0x186   : > { %p471_p9 = pneg %p470_p7 }
 0x187   : > { %p477_p13 = por %p476_p11, %p475_p6 }
 0x189   : > { %p478_p8 = pnand %p477_p13, %p471_p9 }
 0x18b   : > { %481 = shalt.err (!%p478_p8)
}
 0x18c   : > { %s526_s3 = smov 128   ;;  %s527_s4 = smov 8  }
 0x18d   : > { %368 = dma.vmem_to_hbm [thread:$0]  (%p726_p12), %s673_s14, 256, %s671_s19, %s228_s23, %s526_s3, %s526_s3, %s527_s4  }
 0x18e PF: > { %s265_s7 = sand.u32 1, %s508_s9   ;;  %p727_p10 = scmp.ne.s32.totalorder %s724_s22, 0 }
 0x18f   : > { %p728_p0 = scmp.ge.s32.totalorder %s520_s12, 2  ;;  %s266_s8 = scalar_lea.sflag [#allocation4], %s265_s7 }
 0x191   : > { %p375_p2 = pnand %p728_p0, %p727_p10 }
 0x193   : > { %503 = dma.done.wait (!%p375_p2), %s266_s8, 256  }
 0x194   : > { %505 = vsyncadd (!%p375_p2), %s266_s8, 4294967040  ;;  %p16_p4 = scmp.ge.s32.totalorder %s568_s15, 4   ;;  %s729_s9 = smov %s512_s10 }
 0x195   : > { %s730_s10 = smov %s516_s11  ;;  %s731_s11 = smov %s580_s18 }
 0x196   : > { %s732_s12 = smov %s568_s15  ;;  %18 = sbr.rel (!%p16_p4) target bundleno = 5 (0x5), region = 81 }
 0x19d   :  { %279 = vsyncpa [#allocation3], 1 }
 0x19e   :  { %281 = vsyncpa [#allocation3 + $0x1], 1 }
 0x19f   :  { %282 = vsyncpa [#allocation4], 1 }
 0x1a0   :  { %284 = vsyncpa [#allocation4 + $0x1], 1 }

</bundles_post_ra>
